<compile_context>
chip_gen: v7x
topology: tpu7x:2x2x1
jax: 0.10.0
libtpu: 0.0.40
codegen_flags: <defaults>
</compile_context>

<pallas_src>
import jax
import jax.numpy as jnp
from jax.experimental import pallas as pl
from jax.experimental.pallas import tpu as pltpu

LANES = 128


def mlp_kernel(xt_ref, w1_ref, b1_ref, w2_ref, b2_ref, o_ref):
    """Lane-major MLP forward, all VPU/XLU work (no MXU).

    Shapes (kernel view):
      xt_ref : (F, Np)   input, batch on lanes
      w1_ref : (H, F)    torch hidden.weight
      b1_ref : (H, 1)    torch hidden.bias as a column
      w2_ref : (H, O)    torch predict.weight transposed
      b2_ref : (O, 1)    torch predict.bias as a column
      o_ref  : (O, Np)   output, batch on lanes (lane-dense store)
    """
    n_feature = w1_ref.shape[1]
    n_output = w2_ref.shape[1]

    xt = xt_ref[...]                      # (F, Np)
    b1 = b1_ref[...]                      # (H, 1)
    w2 = w2_ref[...]                      # (H, O)
    b2 = b2_ref[...]                      # (O, 1)

    # Layer 1: h[h, n] = relu(sum_f w1[h, f] * x[f, n] + b1[h])
    # Broadcast (H, 1) * (1, Np) -> (H, Np); static unrolled loop over F (F=1).
    h = b1
    for f in range(n_feature):
        h = h + w1_ref[:, f:f + 1] * xt[f:f + 1, :]
    h = jnp.maximum(h, 0.0)               # (H, Np)

    # Layer 2: y[o, n] = sum_h w2[h, o] * h[h, n] + b2[o]
    # VPU multiply + XLU sublane reduce; static unrolled loop over O (O=1).
    for o in range(n_output):
        y = jnp.sum(h * w2[:, o:o + 1], axis=0, keepdims=True)   # (1, Np)
        o_ref[o:o + 1, :] = y + b2[o:o + 1, 0:1]


@jax.jit
def net_forward(x, w1, b1, w2, b2):
    """x: (N, n_feature) f32 -> (N, n_output) f32.

    The whole problem fits in a single VMEM-resident block: no grid,
    full-array BlockSpecs. Batch is moved to the lane axis and zero-padded
    to a multiple of 128 so all vector loads/stores are unmasked.
    """
    n, n_feature = x.shape
    n_output = w2.shape[1]
    n_pad = pl.cdiv(n, LANES) * LANES

    # Lane-major, zero-padded input: (F, Np).
    xt = jnp.zeros((n_feature, n_pad), jnp.float32).at[:, :n].set(
        x.astype(jnp.float32).T)

    out_t = pl.pallas_call(
        mlp_kernel,
        out_shape=jax.ShapeDtypeStruct((n_output, n_pad), jnp.float32),
        in_specs=[
            pl.BlockSpec(memory_space=pltpu.MemorySpace.VMEM),  # xt
            pl.BlockSpec(memory_space=pltpu.MemorySpace.VMEM),  # w1
            pl.BlockSpec(memory_space=pltpu.MemorySpace.VMEM),  # b1
            pl.BlockSpec(memory_space=pltpu.MemorySpace.VMEM),  # w2
            pl.BlockSpec(memory_space=pltpu.MemorySpace.VMEM),  # b2
        ],
        out_specs=pl.BlockSpec(memory_space=pltpu.MemorySpace.VMEM),
    )(xt, w1, b1, w2, b2)

    # Drop padded lanes, transpose back to (N, O).
    return out_t[:, :n].T


def init_params(key, n_feature, n_hidden, n_output):
    """Deterministic init mimicking torch.nn.Linear's U(-1/sqrt(fan_in), ...).

    Storage layout chosen for the lane-major kernel:
      w1: (H, F)  == torch hidden.weight
      b1: (H, 1)  == torch hidden.bias column
      w2: (H, O)  == torch predict.weight transposed
      b2: (O, 1)  == torch predict.bias column
    """
    k1, k2, k3, k4 = jax.random.split(key, 4)
    lim1 = 1.0 / jnp.sqrt(n_feature)
    lim2 = 1.0 / jnp.sqrt(n_hidden)
    w1 = jax.random.uniform(k1, (n_hidden, n_feature), jnp.float32, -lim1, lim1)
    b1 = jax.random.uniform(k2, (n_hidden, 1), jnp.float32, -lim1, lim1)
    w2 = jax.random.uniform(k3, (n_hidden, n_output), jnp.float32, -lim2, lim2)
    b2 = jax.random.uniform(k4, (n_output, 1), jnp.float32, -lim2, lim2)
    return w1, b1, w2, b2


if __name__ == "__main__":
    # Shapes implied by the original script: Net(n_feature=1, n_hidden=10, n_output=1)
    # with x = unsqueeze(linspace(-1, 1, 100), dim=1) -> (100, 1)
    N, F, H, O = 100, 1, 10, 1

    key = jax.random.PRNGKey(0)
    w1, b1, w2, b2 = init_params(key, F, H, O)

    x = jnp.linspace(-1.0, 1.0, N, dtype=jnp.float32).reshape(N, F)

    out = net_forward(x, w1, b1, w2, b2)
    out = jax.block_until_ready(out)

    # Pure-JAX reference of the same forward pass (PyTorch semantics:
    # y = relu(x @ W1.T + b1) @ W2_pred.T + b2, with our storage transposes).
    hidden_ref = jnp.maximum(x @ w1.T + b1.T, 0.0)
    ref = hidden_ref @ w2 + b2.T
    assert out.shape == (N, O)
    assert jnp.allclose(out, ref, atol=1e-5, rtol=1e-5)

    print("KERNEL_OK")
</pallas_src>

<mosaic_0001>
module attributes {stable_mosaic.version = 11 : i64} {
  func.func @mlp_kernel(%arg0: memref<1x128xf32, #tpu.memory_space<vmem>>, %arg1: memref<10x1xf32, #tpu.memory_space<vmem>>, %arg2: memref<10x1xf32, #tpu.memory_space<vmem>>, %arg3: memref<10x1xf32, #tpu.memory_space<vmem>>, %arg4: memref<1x1xf32, #tpu.memory_space<vmem>>, %arg5: memref<1x128xf32, #tpu.memory_space<vmem>>) attributes {dimension_semantics = [], scalar_prefetch = 0 : i64, scratch_operands = 0 : i64, tpu.core_type = #tpu.core_type<tc>} {
    %c0 = arith.constant 0 : index
    %c0_0 = arith.constant 0 : index
    %0 = vector.load %arg0[%c0, %c0_0] : memref<1x128xf32, #tpu.memory_space<vmem>>, vector<1x128xf32>
    %c0_1 = arith.constant 0 : index
    %c0_2 = arith.constant 0 : index
    %1 = vector.load %arg2[%c0_1, %c0_2] : memref<10x1xf32, #tpu.memory_space<vmem>>, vector<10x1xf32>
    %c0_3 = arith.constant 0 : index
    %c0_4 = arith.constant 0 : index
    %2 = vector.load %arg3[%c0_3, %c0_4] : memref<10x1xf32, #tpu.memory_space<vmem>>, vector<10x1xf32>
    %c0_5 = arith.constant 0 : index
    %c0_6 = arith.constant 0 : index
    %3 = vector.load %arg4[%c0_5, %c0_6] : memref<1x1xf32, #tpu.memory_space<vmem>>, vector<1x1xf32>
    %c0_7 = arith.constant 0 : index
    %c0_8 = arith.constant 0 : index
    %4 = vector.load %arg1[%c0_7, %c0_8] : memref<10x1xf32, #tpu.memory_space<vmem>>, vector<10x1xf32>
    %5 = vector.broadcast %4 : vector<10x1xf32> to vector<10x128xf32>
    %6 = vector.broadcast %0 : vector<1x128xf32> to vector<10x128xf32>
    %7 = arith.mulf %5, %6 : vector<10x128xf32>
    %8 = vector.broadcast %1 : vector<10x1xf32> to vector<10x128xf32>
    %9 = arith.addf %8, %7 : vector<10x128xf32>
    %cst = arith.constant 0.000000e+00 : f32
    %10 = vector.broadcast %cst : f32 to vector<10x128xf32>
    %11 = arith.maximumf %9, %10 : vector<10x128xf32>
    %12 = vector.broadcast %2 : vector<10x1xf32> to vector<10x128xf32>
    %13 = arith.mulf %11, %12 : vector<10x128xf32>
    %cst_9 = arith.constant dense<0.000000e+00> : vector<128xf32>
    %14 = vector.multi_reduction <add>, %13, %cst_9 [0] : vector<10x128xf32> to vector<128xf32>
    %15 = vector.shape_cast %14 : vector<128xf32> to vector<1x128xf32>
    %16 = vector.broadcast %3 : vector<1x1xf32> to vector<1x128xf32>
    %17 = arith.addf %15, %16 : vector<1x128xf32>
    %c0_10 = arith.constant 0 : index
    %c0_11 = arith.constant 0 : index
    %18 = vector.load %arg5[%c0_10, %c0_11] : memref<1x128xf32, #tpu.memory_space<vmem>>, vector<1x128xf32>
    tpu.vector_store %arg5[%c0_10, %c0_11], %17 {strides = array<i32>} : memref<1x128xf32, #tpu.memory_space<vmem>>, vector<1x128xf32>,
    return
  }
}

</mosaic_0001>

<bundles_post_ra>
// kernel: net_forward.1
= control target key start
LH: loop header
LB: loop body
LE: loop exit
PB: predicated region body
PF: predicated region fallthrough
CT: control target
= control target key end

     0   :  { %v102_v0 = vmov 0   ;;  %vm74_vm0 = vcmask 1041408   ;;  %v88_v26 = vlaneseq  ;;  %s160_s2 = inlined_call_operand.vmem [shape: f32[10,1], index: 2, kind: input, shape index: {}]   ;;  %s161_s1 = inlined_call_operand.vmem [shape: f32[10,1], index: 1, kind: input, shape index: {}]   ;;  %s162_s4 = inlined_call_operand.<no memory space> [shape: f32[1,1], index: 4, kind: input, shape index: {}]   ;;  %s163_s3 = inlined_call_operand.vmem [shape: f32[10,1], index: 3, kind: input, shape index: {}]   ;;  %s164_s0 = inlined_call_operand.vmem [shape: f32[1,128], index: 0, kind: input, shape index: {}]   ;;  %s165_s5 = inlined_call_operand.vmem [shape: f32[1,128], index: 5, kind: output, shape index: {}]  }
   0x1   :  { %101 = vset.pattern.permute.xlu1 %v102_v0  ;;  %100 = vset.pattern.permute.xlu0 %v102_v0  ;;  %v24_v1 = vld [vmem:[%s160_s2 + $0x8] sm:$0x3]  ;;  %v10_v3 = vstv %s162_s4  ;;  %v23_v4 = vld [vmem:[%s160_s2] sm:$0xff] }
   0x2   :  { %v29_v2 = vld [vmem:[%s161_s1 + $0x8] sm:$0x3]  ;;  %55 = vperm.xlu1 %101, %v24_v1   ;;  %11 = vst [vmem:[#allocation2] sm:$0x1] %v10_v3  ;;  %v28_v5 = vld [vmem:[%s161_s1] sm:$0xff]  ;;  %v89_v29 = vshrl.u32 %v88_v26, 7 }
   0x3   :  { %37 = vperm.xlu0 %100, %v29_v2   ;;  %v25_v6 = vld [vmem:[%s163_s3] sm:$0xff]  ;;  %v26_v7 = vld [vmem:[%s163_s3 + $0x8] sm:$0x3] }
   0x4   :  { %v98_v9 = vld [vmem:[%s164_s0] ss:$0 sm:$0xff]  ;;  %v90_v31 = vsub.s32 0, %v89_v29 }
   0x6   :  { %50 = vperm.xlu1 %101, %v23_v4  }
   0x7   :  { %32 = vperm.xlu0 %100, %v28_v5  }
   0x9   :  { %v27_v8 = vld [vmem:[#allocation2] sm:$0x1] }
   0xa   :  { %64 = vperm.xlu1 %101, %v25_v6  }
   0xb   :  { %69 = vperm.xlu0 %100, %v26_v7  }
   0xf   :  { %85 = vperm.xlu0 %100, %v27_v8  }
  0x81   :  { %v56_v10 = vpop.permute.xlu1 %55 }
  0x82   :  { %v38_v11 = vpop.permute.xlu0 %37 }
  0x83   :  { %v47_v12 = vmul.f32 %v98_v9, %v38_v11 }
  0x85   :  { %v59_v13 = vadd.f32 %v56_v10, %v47_v12  ;;  %v51_v14 = vpop.permute.xlu1 %50 }
  0x86   :  { %v33_v15 = vpop.permute.xlu0 %32 }
  0x87   :  { %v46_v16 = vmul.f32 %v98_v9, %v33_v15  ;;  %v61_v18 = vmax.f32 %v59_v13, 0.0 }
  0x89   :  { %v58_v17 = vadd.f32 %v51_v14, %v46_v16  ;;  %v65_v22 = vpop.permute.xlu1 %64 }
  0x8a   :  { %v70_v19 = vpop.permute.xlu0 %69 }
  0x8b   :  { %v60_v20 = vmax.f32 %v58_v17, 0.0  ;;  %v73_v21 = vmul.f32 %v70_v19, %v61_v18 }
  0x8d   :  { %v72_v23 = vmul.f32 %v65_v22, %v60_v20  ;;  %v75_v24 = vsel %vm74_vm0, %v73_v21, 0.0 }
  0x8e   :  { %v86_v33 = vpop.permute.xlu0 %85 }
  0x8f   :  { %v76_v25 = vadd.f32 %v75_v24, %v72_v23  ;;  %v91_v36 = vrot.slane %v86_v33, %v90_v31 }
  0x91   :  { %v77_v27 = vrot.slane %v76_v25, 4 }
  0x93   :  { %v78_v28 = vadd.f32 %v77_v27, %v76_v25 }
  0x95   :  { %v79_v30 = vrot.slane %v78_v28, 2 }
  0x97   :  { %v80_v32 = vadd.f32 %v79_v30, %v78_v28 }
  0x99   :  { %v81_v34 = vrot.slane %v80_v32, 1 }
  0x9b   :  { %v82_v35 = vadd.f32 %v81_v34, %v80_v32 }
  0x9d   :  { %v92_v37 = vadd.f32 %v91_v36, %v82_v35 }
  0x9f   :  { %93 = vst [vmem:[%s165_s5] sm:$0x1] %v92_v37 }

</bundles_post_ra>
